<compile_context>
chip_gen: v5e
topology: v5e:2x2
jax: 0.10.0
libtpu: 0.0.40
codegen_flags: <defaults>
</compile_context>

<pallas_src>
import jax
import jax.numpy as jnp
from jax.experimental import pallas as pl
from jax.experimental.pallas import tpu as pltpu


LANES = 128
SUBLANES = 8
# (4096, 128) f32 block = 2 MiB.  2 inputs x 2 pipeline buffers = 8 MiB plus
# the (possibly double-buffered) 2 MiB f32 output block -> ~12 MiB worst case,
# comfortably inside v5e's 16 MiB scoped-VMEM default.
MAX_BLOCK_ROWS = 4096


def _sse_partial_kernel(o_ref, t_ref, acc_ref):
    """Sum-of-squared-differences accumulated into a VMEM vector block.

    o_ref, t_ref : (block_rows, 128) VMEM tiles in the inputs' native dtype
    acc_ref      : (block_rows, 128) f32 output block; its index_map is
                   constant along the last ("arbitrary") grid axis, so it
                   stays resident in VMEM and acts as the accumulator.
    """
    step = pl.program_id(1)

    @pl.when(step == 0)
    def _():
        acc_ref[...] = jnp.zeros_like(acc_ref)

    d = o_ref[...].astype(jnp.float32) - t_ref[...].astype(jnp.float32)
    acc_ref[...] += d * d  # pure VPU work each step; no XLU / scalar chain


def _sse(output: jax.Array, target: jax.Array) -> jax.Array:
    """Sum of squared differences over all elements (f32 scalar)."""
    assert output.shape == target.shape
    n = output.size

    flat_o = output.reshape(-1)
    flat_t = target.reshape(-1)

    rows = n // LANES
    block_rows = min(MAX_BLOCK_ROWS, (rows // SUBLANES) * SUBLANES)

    sse = jnp.float32(0.0)
    main = 0
    if block_rows >= SUBLANES:
        n_blocks = rows // block_rows
        # Split the reduction into 2 independent partials when possible; the
        # leading "parallel" axis lets v7x shard them across its 2 TCs.
        n_splits = 2 if (n_blocks >= 2 and n_blocks % 2 == 0) else 1
        steps = n_blocks // n_splits
        main = n_blocks * block_rows * LANES

        o_main = flat_o[:main].reshape(n_splits, steps * block_rows, LANES)
        t_main = flat_t[:main].reshape(n_splits, steps * block_rows, LANES)

        partials = pl.pallas_call(
            _sse_partial_kernel,
            out_shape=jax.ShapeDtypeStruct(
                (n_splits, block_rows, LANES), jnp.float32),
            grid_spec=pltpu.PrefetchScalarGridSpec(
                num_scalar_prefetch=0,
                grid=(n_splits, steps),
                in_specs=[
                    pl.BlockSpec((None, block_rows, LANES),
                                 lambda s, i: (s, i, 0)),
                    pl.BlockSpec((None, block_rows, LANES),
                                 lambda s, i: (s, i, 0)),
                ],
                out_specs=pl.BlockSpec((None, block_rows, LANES),
                                       lambda s, i: (s, 0, 0)),
            ),
            compiler_params=pltpu.CompilerParams(
                dimension_semantics=("parallel", "arbitrary"),
            ),
        )(o_main, t_main)

        # Tiny epilogue reduction (<= a few MiB) is free in XLA.
        sse = jnp.sum(partials, dtype=jnp.float32)

    if main < n:
        d_tail = (flat_o[main:].astype(jnp.float32)
                  - flat_t[main:].astype(jnp.float32))
        sse = sse + jnp.sum(d_tail * d_tail)

    return sse


def criterion_forward(output: jax.Array, *targets: jax.Array) -> jax.Array:
    """Criterion.forward(output, *targets) -> scalar.

    Concrete instantiation: mean squared error, averaged over all targets
    (equivalent to torch.nn.functional.mse_loss(output, t, reduction="mean")
    for a single target)."""
    assert len(targets) >= 1
    total = jnp.float32(0.0)
    for t in targets:
        total = total + _sse(output, t) / jnp.float32(output.size)
    return total / jnp.float32(len(targets))


if __name__ == "__main__":
    key = jax.random.PRNGKey(0)
    k1, k2, k3, k4 = jax.random.split(key, 4)

    # Small NCHW conv-style inputs: Criterion.forward(output, target).
    x = jax.random.normal(k1, (2, 4, 16, 16), dtype=jnp.float32)
    y = jax.random.normal(k2, (2, 4, 16, 16), dtype=jnp.float32)
    loss = jax.block_until_ready(criterion_forward(x, y))
    ref = jnp.mean((x - y) ** 2)
    assert jnp.allclose(loss, ref, rtol=1e-5, atol=1e-6), (loss, ref)

    # Second check: odd shape exercising the full-block + plain-JAX-tail path.
    a = jax.random.normal(k3, (2, 3, 37, 41), dtype=jnp.float32)
    b = jax.random.normal(k4, (2, 3, 37, 41), dtype=jnp.float32)
    loss2 = jax.block_until_ready(criterion_forward(a, b))
    ref2 = jnp.mean((a - b) ** 2)
    assert jnp.allclose(loss2, ref2, rtol=1e-5, atol=1e-6), (loss2, ref2)

    print("KERNEL_OK")
</pallas_src>

<mosaic_0001>
module attributes {stable_mosaic.version = 11 : i64} {
  func.func @_sse_partial_kernel(%arg0: i32, %arg1: i32, %arg2: memref<1x16x128xf32, #tpu.memory_space<vmem>>, %arg3: memref<1x16x128xf32, #tpu.memory_space<vmem>>, %arg4: memref<1x16x128xf32, #tpu.memory_space<vmem>>) attributes {dimension_semantics = [#tpu.dimension_semantics<parallel>, #tpu.dimension_semantics<arbitrary>], iteration_bounds = array<i64: 1, 1>, scalar_prefetch = 0 : i64, scratch_operands = 0 : i64, tpu.core_type = #tpu.core_type<tc>, window_params = [{transform_indices = @transform_0, window_bounds = array<i64: 1, 16, 128>}, {transform_indices = @transform_1, window_bounds = array<i64: 1, 16, 128>}, {transform_indices = @transform_2, window_bounds = array<i64: 1, 16, 128>}]} {
    %c0_i32 = arith.constant 0 : i32
    %0 = arith.cmpi eq, %arg1, %c0_i32 : i32
    %1 = arith.extui %0 : i1 to i32
    %c0_i32_0 = arith.constant 0 : i32
    %2 = arith.cmpi ne, %1, %c0_i32_0 : i32
    scf.if %2 {
      %cst = arith.constant 0.000000e+00 : f32
      %15 = vector.broadcast %cst : f32 to vector<16x128xf32>
      %c0_12 = arith.constant 0 : index
      %c0_13 = arith.constant 0 : index
      %c0_14 = arith.constant 0 : index
      %16 = vector.load %arg4[%c0_12, %c0_13, %c0_14] : memref<1x16x128xf32, #tpu.memory_space<vmem>>, vector<1x16x128xf32>
      %17 = vector.shape_cast %16 : vector<1x16x128xf32> to vector<16x128xf32>
      %18 = vector.shape_cast %15 : vector<16x128xf32> to vector<1x16x128xf32>
      tpu.vector_store %arg4[%c0_12, %c0_13, %c0_14], %18 {strides = array<i32>} : memref<1x16x128xf32, #tpu.memory_space<vmem>>, vector<1x16x128xf32>,
    } else {
    }
    %c0 = arith.constant 0 : index
    %c0_1 = arith.constant 0 : index
    %c0_2 = arith.constant 0 : index
    %3 = vector.load %arg2[%c0, %c0_1, %c0_2] : memref<1x16x128xf32, #tpu.memory_space<vmem>>, vector<1x16x128xf32>
    %4 = vector.shape_cast %3 : vector<1x16x128xf32> to vector<16x128xf32>
    %c0_3 = arith.constant 0 : index
    %c0_4 = arith.constant 0 : index
    %c0_5 = arith.constant 0 : index
    %5 = vector.load %arg3[%c0_3, %c0_4, %c0_5] : memref<1x16x128xf32, #tpu.memory_space<vmem>>, vector<1x16x128xf32>
    %6 = vector.shape_cast %5 : vector<1x16x128xf32> to vector<16x128xf32>
    %7 = arith.subf %4, %6 : vector<16x128xf32>
    %c0_6 = arith.constant 0 : index
    %c0_7 = arith.constant 0 : index
    %c0_8 = arith.constant 0 : index
    %8 = vector.load %arg4[%c0_6, %c0_7, %c0_8] : memref<1x16x128xf32, #tpu.memory_space<vmem>>, vector<1x16x128xf32>
    %9 = vector.shape_cast %8 : vector<1x16x128xf32> to vector<16x128xf32>
    %10 = arith.mulf %7, %7 : vector<16x128xf32>
    %11 = arith.addf %9, %10 : vector<16x128xf32>
    %c0_9 = arith.constant 0 : index
    %c0_10 = arith.constant 0 : index
    %c0_11 = arith.constant 0 : index
    %12 = vector.load %arg4[%c0_9, %c0_10, %c0_11] : memref<1x16x128xf32, #tpu.memory_space<vmem>>, vector<1x16x128xf32>
    %13 = vector.shape_cast %12 : vector<1x16x128xf32> to vector<16x128xf32>
    %14 = vector.shape_cast %11 : vector<16x128xf32> to vector<1x16x128xf32>
    tpu.vector_store %arg4[%c0_9, %c0_10, %c0_11], %14 {strides = array<i32>} : memref<1x16x128xf32, #tpu.memory_space<vmem>>, vector<1x16x128xf32>,
    return
  }
  func.func @transform_0(%arg0: i32, %arg1: i32) -> (i32, i32, i32) {
    %c0_i32 = arith.constant 0 : i32
    %c0_i32_0 = arith.constant 0 : i32
    return %arg0, %arg1, %c0_i32 : i32, i32, i32
  }
  func.func @transform_1(%arg0: i32, %arg1: i32) -> (i32, i32, i32) {
    %c0_i32 = arith.constant 0 : i32
    %c0_i32_0 = arith.constant 0 : i32
    return %arg0, %arg1, %c0_i32 : i32, i32, i32
  }
  func.func @transform_2(%arg0: i32, %arg1: i32) -> (i32, i32, i32) {
    %c0_i32 = arith.constant 0 : i32
    %c0_i32_0 = arith.constant 0 : i32
    %c0_i32_1 = arith.constant 0 : i32
    return %arg0, %c0_i32, %c0_i32_0 : i32, i32, i32
  }
}

</mosaic_0001>

<bundles_post_ra>
// kernel: tpu_custom_call.1
= control target key start
LH: loop header
LB: loop body
LE: loop exit
PB: predicated region body
PF: predicated region fallthrough
CT: control target
= control target key end

     0   :  { %7 = vsyncpa [#allocation3], 0  ;;  %s206_s0 = inlined_call_operand.hbm [shape: f32[1,16,128], index: 0, kind: input, shape index: {}]   ;;  %s207_s1 = inlined_call_operand.hbm [shape: f32[1,16,128], index: 1, kind: input, shape index: {}]   ;;  %s208_s2 = inlined_call_operand.hbm [shape: f32[1,16,128], index: 2, kind: output, shape index: {}]  }
   0x1   :  { %8 = vsyncpa [#allocation6], 0 }
   0x2   :  { %9 = vsyncpa [#allocation4], 0  ;;  %s14_s11 = sshll.u32 %s206_s0, 4  ;;  %s168_s12 = smov [#allocation2]   ;;  %s15_s11 = int_to_ptr.hbm [resolvable:$true] %s14_s11 }
   0x3   :  { %s16_s13 = sshll.u32 %s168_s12, 4  ;;  %s27_s16 = sshll.u32 %s207_s1, 4  ;;  %s17_s13 = int_to_ptr.vmem [resolvable:$true] %s16_s13  ;;  %s28_s16 = int_to_ptr.hbm [resolvable:$true] %s27_s16 }
   0x4   :  { %s169_s17 = smov 128   ;;  %s170_s18 = smov 8  }
   0x5   :  { %22 = dma.hbm_to_vmem [thread:$0]  %s15_s11, 256, %s17_s13, [#allocation3], %s169_s17, %s169_s17, %s170_s18  }
   0x6   :  { %s171_s19 = smov [#allocation5]  }
   0x7   :  { %s29_s20 = sshll.u32 %s171_s19, 4  ;;  %s30_s20 = int_to_ptr.vmem [resolvable:$true] %s29_s20 }
   0x8   :  { %35 = dma.hbm_to_vmem [thread:$0]  %s28_s16, 256, %s30_s20, [#allocation6], %s169_s17, %s169_s17, %s170_s18  }
   0x9   :  { %162 = dma.done.wait [#allocation3], 256  }
   0xa   :  { %163 = vsyncadd [#allocation3], 4294967040 }
   0xb   :  { %164 = dma.done.wait [#allocation6], 256  }
   0xc   :  { %165 = vsyncadd [#allocation6], 4294967040  ;;  %v50_v0 = vld [vmem:[#allocation2] sm:$0xff]  ;;  %v52_v1 = vld [vmem:[#allocation5] sm:$0xff]  ;;  %s172_s0 = smov [#allocation7]   ;;  %s70_s23 = sshll.u32 %s208_s2, 4  ;;  %s71_s23 = int_to_ptr.hbm [resolvable:$true] %s70_s23 }
   0xd   :  { %v51_v2 = vld [vmem:[#allocation2 + $0x8] sm:$0xff]  ;;  %v54_v3 = vsub.f32 %v50_v0, %v52_v1  ;;  %v53_v4 = vld [vmem:[#allocation5 + $0x8] sm:$0xff]  ;;  %s68_s1 = sshll.u32 %s172_s0, 4  ;;  %s69_s1 = int_to_ptr.vmem [resolvable:$true] %s68_s1 }
   0xe   :  { %v55_v5 = vsub.f32 %v51_v2, %v53_v4 }
   0xf   :  { %v58_v6 = vmul.f32 %v54_v3, %v54_v3 }
  0x10   :  { %v59_v7 = vmul.f32 %v55_v5, %v55_v5 }
  0x11   :  { %62 = vst [vmem:[#allocation7] sm:$0xff] %v58_v6 }
  0x12   :  { %63 = vst [vmem:[#allocation7 + $0x8] sm:$0xff] %v59_v7 }
  0x13   :  { %76 = dma.vmem_to_hbm [thread:$0]  %s69_s1, 256, %s71_s23, [#allocation4], %s169_s17, %s169_s17, %s170_s18  }
  0x14   :  { %166 = dma.done.wait [#allocation4], 256  }
  0x15   :  { %167 = vsyncadd [#allocation4], 4294967040 }
  0x16   :  { %81 = vsyncpa [#allocation3], 1 }
  0x17   :  { %82 = vsyncpa [#allocation6], 1 }
  0x18   :  { %83 = vsyncpa [#allocation4], 1 }

</bundles_post_ra>
